<compile_context>
chip_gen: v5e
topology: v5e:2x2
jax: 0.10.0
libtpu: 0.0.40
codegen_flags: <defaults>
</compile_context>

<pallas_src>
import jax
import jax.numpy as jnp
import numpy as np
from jax.experimental import pallas as pl
from jax.experimental.pallas import tpu as pltpu

DIM = 64
HEADS = 8
DK = DIM // HEADS            # 8
SEQ = 2                      # h * SEQ * dk must equal 2*dim for Linear(2*dim, 2*dim)
DROP_P = 0.2
SCALE = DK ** (-0.5)

ALIGN = 16                   # sublane alignment that is also bf16-tile friendly
TB_CAP = 1024                # batch rows per grid step (perf feedback: >= 1024)


def _round_up(x, m):
    return (x + m - 1) // m * m


def _choose_tiling(batch, cap=TB_CAP):
    """Adaptive batch tile: big tiles, minimal padding, even #steps when > 1."""
    b_al = _round_up(max(batch, 1), ALIGN)
    n = pl.cdiv(b_al, cap)
    if n == 1 and b_al >= 512:
        n = 2                        # let v7x's two TensorCores split the batch
    if n > 1 and (n % 2 == 1):
        n += 1                       # even step count shards cleanly across 2 TCs
    tb = _round_up(pl.cdiv(b_al, n), ALIGN)
    return tb, n * tb, n


def _mha_kernel(x_ref, mask_ref, wqkv_ref, sred_ref, sbc_ref, wr_ref, b_ref, o_ref):
    """One batch tile per grid step: QKV proj + MHA(+dropout) + output Linear.

    x_ref    : (TB, 2*D)       activations, columns = [pos0 | pos1]
    mask_ref : (4, TB, H)      pre-scaled bf16 dropout mask [m00;m01;m10;m11]
    wqkv_ref : (D, 3*D)        [Wq | Wk | Wv]   (same dtype as x)
    sred_ref : (D, H)          block-diag per-head sum matrix * dk**-0.5
    sbc_ref  : (H, D)          block-diag per-head broadcast matrix
    wr_ref   : (2*D, 2*D)      proj weight, rows pre-permuted to (l, h, dk)
    b_ref    : (1, 2*D)        proj bias
    o_ref    : (TB, 2*D)
    """
    tb = x_ref.shape[0]
    d = DIM

    x = x_ref[...]
    x0 = x[:, :d]                    # query/key/value source, position 0
    x1 = x[:, d:]                    # position 1 (single XLU lane rotate)

    w = wqkv_ref[...]
    # Two (TB,64)@(64,192) matmuls; f32 accumulation regardless of operand dtype.
    qkv0 = jnp.dot(x0, w, preferred_element_type=jnp.float32)
    qkv1 = jnp.dot(x1, w, preferred_element_type=jnp.float32)
    q0, k0, v0 = qkv0[:, :d], qkv0[:, d:2 * d], qkv0[:, 2 * d:]
    q1, k1, v1 = qkv1[:, :d], qkv1[:, d:2 * d], qkv1[:, 2 * d:]

    # All four per-head score maps with ONE MXU push: stack the elementwise
    # products along sublanes and hit the (scaled) block-diag head reducer.
    e = jnp.concatenate([q0 * k0, q0 * k1, q1 * k0, q1 * k1], axis=0)   # (4TB, D)
    s = jnp.dot(e, sred_ref[...], preferred_element_type=jnp.float32)  # (4TB, H)
    s00, s01 = s[:tb], s[tb:2 * tb]
    s10, s11 = s[2 * tb:3 * tb], s[3 * tb:]

    # 2-token softmax via the sigmoid identity: softmax([a,b]) = (sig(a-b), 1-..).
    # tanh form keeps it on the EUP with no divide and saturates cleanly.
    p00 = 0.5 * (jnp.tanh(0.5 * (s00 - s01)) + 1.0)
    p01 = 1.0 - p00
    p10 = 0.5 * (jnp.tanh(0.5 * (s10 - s11)) + 1.0)
    p11 = 1.0 - p10

    # Training-mode dropout on attention probabilities: one fused multiply with
    # the bf16 mask (already scaled by 1/(1-p)), layout-matched to the stack.
    probs = jnp.concatenate([p00, p01, p10, p11], axis=0)               # (4TB, H)
    probs = probs * mask_ref[...].reshape(4 * tb, HEADS).astype(jnp.float32)

    # All four per-head broadcasts with ONE MXU push: (4TB, H) @ (H, D).
    bc = jnp.dot(probs, sbc_ref[...], preferred_element_type=jnp.float32)
    c0 = bc[:tb] * v0 + bc[tb:2 * tb] * v1            # context, query position 0
    c1 = bc[2 * tb:3 * tb] * v0 + bc[3 * tb:] * v1    # context, query position 1

    # Output Linear: split the pre-permuted weight by query position so no lane
    # concat of [c0 | c1] is needed; lane-dense (TB, 128) store.
    wr = wr_ref[...]
    y = (jnp.dot(c0, wr[:d], preferred_element_type=jnp.float32) +
         jnp.dot(c1, wr[d:], preferred_element_type=jnp.float32) + b_ref[...])
    o_ref[...] = y.astype(o_ref.dtype)


def _head_matrices():
    # (D, H) block-diagonal head reducer (pre-scaled) and (H, D) head broadcaster.
    red = np.kron(np.eye(HEADS, dtype=np.float32),
                  np.ones((DK, 1), dtype=np.float32)) * np.float32(SCALE)
    bc = np.kron(np.eye(HEADS, dtype=np.float32),
                 np.ones((1, DK), dtype=np.float32))
    return jnp.asarray(red), jnp.asarray(bc)


def model_forward(x, params, dropout_key=None, train=True):
    wq, wk, wv, wp, bp = params
    batch, seq, dim = x.shape
    assert seq == SEQ and dim == DIM
    act_dtype = x.dtype          # bf16 activations (if provided) halve x DMA

    tb, b_pad, n_steps = _choose_tiling(batch)

    # Free layout change (row-major bitcast, NOT a transpose): (B, L, D) -> (B, L*D).
    x_flat = x.reshape(batch, SEQ * DIM)
    if b_pad != batch:
        x_flat = jnp.pad(x_flat, ((0, b_pad - batch), (0, 0)))

    # Fused QKV weight (cast to activation dtype for the bf16 MXU path when used)
    # and pre-permuted proj weight:
    #   flat_pt[j], j = d*(L*H) + l*H + h  ->  kernel column l*(H*DK) + h*DK + d
    wqkv = jnp.concatenate([wq, wk, wv], axis=1).astype(act_dtype)       # (D, 3D)
    wp_r = wp.reshape(2 * DIM, DK, SEQ, HEADS)                           # [o,d,l,h]
    wr = jnp.transpose(wp_r, (2, 3, 1, 0)).reshape(SEQ * HEADS * DK, 2 * DIM)
    wr = wr.astype(jnp.float32)
    b2 = bp.reshape(1, 2 * DIM).astype(jnp.float32)
    sred, sbc = _head_matrices()

    # Dropout mask (training mode): bf16, pre-scaled (0 or 1.25, both exact in
    # bf16), generated only for the real batch rows, laid out (L*L, B, H) to
    # match the sublane-stacked probability tensor in the kernel.
    if train:
        if dropout_key is None:
            dropout_key = jax.random.PRNGKey(0)
        u = jax.random.uniform(dropout_key, (SEQ * SEQ, batch, HEADS),
                               dtype=jnp.float32)
        mask = jnp.where(u >= DROP_P, 1.0 / (1.0 - DROP_P), 0.0).astype(jnp.bfloat16)
        if b_pad != batch:
            mask = jnp.pad(mask, ((0, 0), (0, b_pad - batch), (0, 0)))
    else:
        mask = jnp.ones((SEQ * SEQ, b_pad, HEADS), jnp.bfloat16)

    out = pl.pallas_call(
        _mha_kernel,
        out_shape=jax.ShapeDtypeStruct((b_pad, 2 * DIM), jnp.float32),
        grid=(n_steps,),
        in_specs=[
            pl.BlockSpec((tb, SEQ * DIM), lambda b: (b, 0)),             # x (B, 128)
            pl.BlockSpec((SEQ * SEQ, tb, HEADS), lambda b: (0, b, 0)),   # dropout mask
            pl.BlockSpec((DIM, 3 * DIM), lambda b: (0, 0)),              # Wqkv
            pl.BlockSpec((DIM, HEADS), lambda b: (0, 0)),                # head reduce
            pl.BlockSpec((HEADS, DIM), lambda b: (0, 0)),                # head bcast
            pl.BlockSpec((2 * DIM, 2 * DIM), lambda b: (0, 0)),          # proj W (perm)
            pl.BlockSpec((1, 2 * DIM), lambda b: (0, 0)),                # proj b
        ],
        out_specs=pl.BlockSpec((tb, 2 * DIM), lambda b: (b, 0)),
        compiler_params=pltpu.CompilerParams(
            dimension_semantics=("parallel",),
            vmem_limit_bytes=48 * 1024 * 1024),
    )(x_flat, mask, wqkv, sred, sbc, wr, b2)

    out = out[:batch]

    # Tail glue (pure reshapes / indexing, as in the module):
    # reshape(B, -1, 2, dim) -> transpose(3, 1) -> split channel 0 / 1.
    t = out.reshape(batch, -1, 2, DIM)
    t = jnp.transpose(t, (0, 3, 2, 1))                     # (B, DIM, 2, 1)
    return [t[:, :, 0, :], t[:, :, 1, :]]


def _reference_forward(x, params):
    """Pure-JAX reference of the intended forward (eval mode, no dropout)."""
    wq, wk, wv, wp, bp = params
    batch, seq, dim = x.shape
    q = (x @ wq).reshape(batch, seq, HEADS, DK).transpose(0, 2, 1, 3)
    k = (x @ wk).reshape(batch, seq, HEADS, DK).transpose(0, 2, 1, 3)
    v = (x @ wv).reshape(batch, seq, HEADS, DK).transpose(0, 2, 1, 3)
    s = jnp.einsum('bhid,bhjd->bhij', q, k) * SCALE
    p = jax.nn.softmax(s, axis=-1)
    ctx = jnp.einsum('bhij,bhjd->bhid', p, v)              # (B, H, L, DK)
    flat = jnp.transpose(ctx, (0, 3, 2, 1)).reshape(batch, -1)
    y = flat @ wp.T + bp
    t = y.reshape(batch, -1, 2, DIM)
    t = jnp.transpose(t, (0, 3, 2, 1))
    return [t[:, :, 0, :], t[:, :, 1, :]]


if __name__ == "__main__":
    key = jax.random.PRNGKey(0)
    kx, kq, kk, kv, kw, kb, kd = jax.random.split(key, 7)

    B = 8
    x = jax.random.normal(kx, (B, SEQ, DIM), dtype=jnp.float32)
    wq = jax.random.normal(kq, (DIM, DIM), dtype=jnp.float32)
    wk = jax.random.normal(kk, (DIM, DIM), dtype=jnp.float32)
    wv = jax.random.normal(kv, (DIM, DIM), dtype=jnp.float32)
    bound = 1.0 / (2 * DIM) ** 0.5                          # nn.Linear default init
    wp = jax.random.uniform(kw, (2 * DIM, 2 * DIM), jnp.float32, -bound, bound)
    bp = jax.random.uniform(kb, (2 * DIM,), jnp.float32, -bound, bound)
    params = (wq, wk, wv, wp, bp)

    # Correctness check (f32 operands, dropout disabled) against the reference.
    got = model_forward(x, params, train=False)
    want = _reference_forward(x, params)
    got = jax.block_until_ready(got)
    for g, w in zip(got, want):
        denom = jnp.max(jnp.abs(w)) + 1e-6
        rel = jnp.max(jnp.abs(g - w)) / denom
        assert float(rel) < 2e-2, f"kernel mismatch vs reference: rel={float(rel)}"

    # Training-mode run with bf16 activations (dropout active, bf16 MXU path).
    outs = model_forward(x.astype(jnp.bfloat16), params, dropout_key=kd, train=True)
    outs = jax.block_until_ready(outs)

    assert outs[0].shape == (B, DIM, 1), outs[0].shape
    assert outs[1].shape == (B, DIM, 1), outs[1].shape
    assert bool(jnp.all(jnp.isfinite(outs[0]))) and bool(jnp.all(jnp.isfinite(outs[1])))
    print("KERNEL_OK")
</pallas_src>

<mosaic_0001>
module attributes {stable_mosaic.version = 11 : i64} {
  func.func @_mha_kernel(%arg0: i32, %arg1: memref<16x128xf32, #tpu.memory_space<vmem>>, %arg2: memref<4x16x8xbf16, #tpu.memory_space<vmem>>, %arg3: memref<64x192xf32, #tpu.memory_space<vmem>>, %arg4: memref<64x8xf32, #tpu.memory_space<vmem>>, %arg5: memref<8x64xf32, #tpu.memory_space<vmem>>, %arg6: memref<128x128xf32, #tpu.memory_space<vmem>>, %arg7: memref<1x128xf32, #tpu.memory_space<vmem>>, %arg8: memref<16x128xf32, #tpu.memory_space<vmem>>) attributes {dimension_semantics = [#tpu.dimension_semantics<parallel>], iteration_bounds = array<i64: 1>, scalar_prefetch = 0 : i64, scratch_operands = 0 : i64, tpu.core_type = #tpu.core_type<tc>, window_params = [{transform_indices = @transform_0, window_bounds = array<i64: 16, 128>}, {transform_indices = @transform_1, window_bounds = array<i64: 4, 16, 8>}, {pipeline_mode = #tpu.pipeline_mode<synchronous>, transform_indices = @transform_2, window_bounds = array<i64: 64, 192>}, {pipeline_mode = #tpu.pipeline_mode<synchronous>, transform_indices = @transform_3, window_bounds = array<i64: 64, 8>}, {pipeline_mode = #tpu.pipeline_mode<synchronous>, transform_indices = @transform_4, window_bounds = array<i64: 8, 64>}, {pipeline_mode = #tpu.pipeline_mode<synchronous>, transform_indices = @transform_5, window_bounds = array<i64: 128, 128>}, {pipeline_mode = #tpu.pipeline_mode<synchronous>, transform_indices = @transform_6, window_bounds = array<i64: 1, 128>}, {transform_indices = @transform_7, window_bounds = array<i64: 16, 128>}]} {
    %c0 = arith.constant 0 : index
    %c0_0 = arith.constant 0 : index
    %0 = vector.load %arg1[%c0, %c0_0] : memref<16x128xf32, #tpu.memory_space<vmem>>, vector<16x128xf32>
    %1 = vector.extract_strided_slice %0 {offsets = [0, 0], sizes = [16, 64], strides = [1, 1]} : vector<16x128xf32> to vector<16x64xf32>
    %2 = vector.extract_strided_slice %0 {offsets = [0, 64], sizes = [16, 64], strides = [1, 1]} : vector<16x128xf32> to vector<16x64xf32>
    %c0_1 = arith.constant 0 : index
    %c0_2 = arith.constant 0 : index
    %3 = vector.load %arg3[%c0_1, %c0_2] : memref<64x192xf32, #tpu.memory_space<vmem>>, vector<64x192xf32>
    %cst = arith.constant dense<0.000000e+00> : vector<16x192xf32>
    %4 = tpu.matmul %1, %3, %cst {dimension_numbers = #tpu.dot_dimension_numbers<[1], [0], [0], [1], [0, 0, 1, 1], [], []>} : vector<16x64xf32>, vector<64x192xf32>, vector<16x192xf32> -> vector<16x192xf32>
    %cst_3 = arith.constant dense<0.000000e+00> : vector<16x192xf32>
    %5 = tpu.matmul %2, %3, %cst_3 {dimension_numbers = #tpu.dot_dimension_numbers<[1], [0], [0], [1], [0, 0, 1, 1], [], []>} : vector<16x64xf32>, vector<64x192xf32>, vector<16x192xf32> -> vector<16x192xf32>
    %6 = vector.extract_strided_slice %4 {offsets = [0, 0], sizes = [16, 64], strides = [1, 1]} : vector<16x192xf32> to vector<16x64xf32>
    %7 = vector.extract_strided_slice %4 {offsets = [0, 64], sizes = [16, 64], strides = [1, 1]} : vector<16x192xf32> to vector<16x64xf32>
    %8 = vector.extract_strided_slice %4 {offsets = [0, 128], sizes = [16, 64], strides = [1, 1]} : vector<16x192xf32> to vector<16x64xf32>
    %9 = vector.extract_strided_slice %5 {offsets = [0, 0], sizes = [16, 64], strides = [1, 1]} : vector<16x192xf32> to vector<16x64xf32>
    %10 = vector.extract_strided_slice %5 {offsets = [0, 64], sizes = [16, 64], strides = [1, 1]} : vector<16x192xf32> to vector<16x64xf32>
    %11 = vector.extract_strided_slice %5 {offsets = [0, 128], sizes = [16, 64], strides = [1, 1]} : vector<16x192xf32> to vector<16x64xf32>
    %12 = arith.mulf %6, %7 : vector<16x64xf32>
    %13 = arith.mulf %6, %10 : vector<16x64xf32>
    %14 = arith.mulf %9, %7 : vector<16x64xf32>
    %15 = arith.mulf %9, %10 : vector<16x64xf32>
    %16 = tpu.concatenate %12, %13, %14, %15 in 0 : vector<16x64xf32>, vector<16x64xf32>, vector<16x64xf32>, vector<16x64xf32> -> vector<64x64xf32>
    %c0_4 = arith.constant 0 : index
    %c0_5 = arith.constant 0 : index
    %17 = vector.load %arg4[%c0_4, %c0_5] : memref<64x8xf32, #tpu.memory_space<vmem>>, vector<64x8xf32>
    %cst_6 = arith.constant dense<0.000000e+00> : vector<64x8xf32>
    %18 = tpu.matmul %16, %17, %cst_6 {dimension_numbers = #tpu.dot_dimension_numbers<[1], [0], [0], [1], [0, 0, 1, 1], [], []>} : vector<64x64xf32>, vector<64x8xf32>, vector<64x8xf32> -> vector<64x8xf32>
    %19 = vector.extract_strided_slice %18 {offsets = [0, 0], sizes = [16, 8], strides = [1, 1]} : vector<64x8xf32> to vector<16x8xf32>
    %20 = vector.extract_strided_slice %18 {offsets = [16, 0], sizes = [16, 8], strides = [1, 1]} : vector<64x8xf32> to vector<16x8xf32>
    %21 = vector.extract_strided_slice %18 {offsets = [32, 0], sizes = [16, 8], strides = [1, 1]} : vector<64x8xf32> to vector<16x8xf32>
    %22 = vector.extract_strided_slice %18 {offsets = [48, 0], sizes = [16, 8], strides = [1, 1]} : vector<64x8xf32> to vector<16x8xf32>
    %23 = arith.subf %19, %20 : vector<16x8xf32>
    %cst_7 = arith.constant 5.000000e-01 : f32
    %24 = vector.broadcast %cst_7 : f32 to vector<16x8xf32>
    %25 = arith.mulf %24, %23 : vector<16x8xf32>
    %26 = math.tanh %25 : vector<16x8xf32>
    %cst_8 = arith.constant 1.000000e+00 : f32
    %27 = vector.broadcast %cst_8 : f32 to vector<16x8xf32>
    %28 = arith.addf %26, %27 : vector<16x8xf32>
    %cst_9 = arith.constant 5.000000e-01 : f32
    %29 = vector.broadcast %cst_9 : f32 to vector<16x8xf32>
    %30 = arith.mulf %29, %28 : vector<16x8xf32>
    %cst_10 = arith.constant 1.000000e+00 : f32
    %31 = vector.broadcast %cst_10 : f32 to vector<16x8xf32>
    %32 = arith.subf %31, %30 : vector<16x8xf32>
    %33 = arith.subf %21, %22 : vector<16x8xf32>
    %cst_11 = arith.constant 5.000000e-01 : f32
    %34 = vector.broadcast %cst_11 : f32 to vector<16x8xf32>
    %35 = arith.mulf %34, %33 : vector<16x8xf32>
    %36 = math.tanh %35 : vector<16x8xf32>
    %cst_12 = arith.constant 1.000000e+00 : f32
    %37 = vector.broadcast %cst_12 : f32 to vector<16x8xf32>
    %38 = arith.addf %36, %37 : vector<16x8xf32>
    %cst_13 = arith.constant 5.000000e-01 : f32
    %39 = vector.broadcast %cst_13 : f32 to vector<16x8xf32>
    %40 = arith.mulf %39, %38 : vector<16x8xf32>
    %cst_14 = arith.constant 1.000000e+00 : f32
    %41 = vector.broadcast %cst_14 : f32 to vector<16x8xf32>
    %42 = arith.subf %41, %40 : vector<16x8xf32>
    %43 = tpu.concatenate %30, %32, %40, %42 in 0 : vector<16x8xf32>, vector<16x8xf32>, vector<16x8xf32>, vector<16x8xf32> -> vector<64x8xf32>
    %c0_15 = arith.constant 0 : index
    %c0_16 = arith.constant 0 : index
    %c0_17 = arith.constant 0 : index
    %44 = vector.load %arg2[%c0_15, %c0_16, %c0_17] : memref<4x16x8xbf16, #tpu.memory_space<vmem>>, vector<4x16x8xbf16>
    %45 = vector.shape_cast %44 : vector<4x16x8xbf16> to vector<64x8xbf16>
    %46 = arith.extf %45 : vector<64x8xbf16> to vector<64x8xf32>
    %47 = arith.mulf %43, %46 : vector<64x8xf32>
    %c0_18 = arith.constant 0 : index
    %c0_19 = arith.constant 0 : index
    %48 = vector.load %arg5[%c0_18, %c0_19] : memref<8x64xf32, #tpu.memory_space<vmem>>, vector<8x64xf32>
    %cst_20 = arith.constant dense<0.000000e+00> : vector<64x64xf32>
    %49 = tpu.matmul %47, %48, %cst_20 {dimension_numbers = #tpu.dot_dimension_numbers<[1], [0], [0], [1], [0, 0, 1, 1], [], []>} : vector<64x8xf32>, vector<8x64xf32>, vector<64x64xf32> -> vector<64x64xf32>
    %50 = vector.extract_strided_slice %49 {offsets = [0, 0], sizes = [16, 64], strides = [1, 1]} : vector<64x64xf32> to vector<16x64xf32>
    %51 = arith.mulf %50, %8 : vector<16x64xf32>
    %52 = vector.extract_strided_slice %49 {offsets = [16, 0], sizes = [16, 64], strides = [1, 1]} : vector<64x64xf32> to vector<16x64xf32>
    %53 = arith.mulf %52, %11 : vector<16x64xf32>
    %54 = arith.addf %51, %53 : vector<16x64xf32>
    %55 = vector.extract_strided_slice %49 {offsets = [32, 0], sizes = [16, 64], strides = [1, 1]} : vector<64x64xf32> to vector<16x64xf32>
    %56 = arith.mulf %55, %8 : vector<16x64xf32>
    %57 = vector.extract_strided_slice %49 {offsets = [48, 0], sizes = [16, 64], strides = [1, 1]} : vector<64x64xf32> to vector<16x64xf32>
    %58 = arith.mulf %57, %11 : vector<16x64xf32>
    %59 = arith.addf %56, %58 : vector<16x64xf32>
    %c0_21 = arith.constant 0 : index
    %c0_22 = arith.constant 0 : index
    %60 = vector.load %arg6[%c0_21, %c0_22] : memref<128x128xf32, #tpu.memory_space<vmem>>, vector<128x128xf32>
    %61 = vector.extract_strided_slice %60 {offsets = [0, 0], sizes = [64, 128], strides = [1, 1]} : vector<128x128xf32> to vector<64x128xf32>
    %cst_23 = arith.constant dense<0.000000e+00> : vector<16x128xf32>
    %62 = tpu.matmul %54, %61, %cst_23 {dimension_numbers = #tpu.dot_dimension_numbers<[1], [0], [0], [1], [0, 0, 1, 1], [], []>} : vector<16x64xf32>, vector<64x128xf32>, vector<16x128xf32> -> vector<16x128xf32>
    %63 = vector.extract_strided_slice %60 {offsets = [64, 0], sizes = [64, 128], strides = [1, 1]} : vector<128x128xf32> to vector<64x128xf32>
    %cst_24 = arith.constant dense<0.000000e+00> : vector<16x128xf32>
    %64 = tpu.matmul %59, %63, %cst_24 {dimension_numbers = #tpu.dot_dimension_numbers<[1], [0], [0], [1], [0, 0, 1, 1], [], []>} : vector<16x64xf32>, vector<64x128xf32>, vector<16x128xf32> -> vector<16x128xf32>
    %65 = arith.addf %62, %64 : vector<16x128xf32>
    %c0_25 = arith.constant 0 : index
    %c0_26 = arith.constant 0 : index
    %66 = vector.load %arg7[%c0_25, %c0_26] : memref<1x128xf32, #tpu.memory_space<vmem>>, vector<1x128xf32>
    %67 = vector.broadcast %66 : vector<1x128xf32> to vector<16x128xf32>
    %68 = arith.addf %65, %67 : vector<16x128xf32>
    %c0_27 = arith.constant 0 : index
    %c0_28 = arith.constant 0 : index
    %69 = vector.load %arg8[%c0_27, %c0_28] : memref<16x128xf32, #tpu.memory_space<vmem>>, vector<16x128xf32>
    tpu.vector_store %arg8[%c0_27, %c0_28], %68 {strides = array<i32>} : memref<16x128xf32, #tpu.memory_space<vmem>>, vector<16x128xf32>,
    return
  }
  func.func @transform_0(%arg0: i32) -> (i32, i32) {
    %c0_i32 = arith.constant 0 : i32
    %c0_i32_0 = arith.constant 0 : i32
    return %arg0, %c0_i32 : i32, i32
  }
  func.func @transform_1(%arg0: i32) -> (i32, i32, i32) {
    %c0_i32 = arith.constant 0 : i32
    %c0_i32_0 = arith.constant 0 : i32
    %c0_i32_1 = arith.constant 0 : i32
    return %c0_i32, %arg0, %c0_i32_0 : i32, i32, i32
  }
  func.func @transform_2(%arg0: i32) -> (i32, i32) {
    %c0_i32 = arith.constant 0 : i32
    %c0_i32_0 = arith.constant 0 : i32
    %c0_i32_1 = arith.constant 0 : i32
    return %c0_i32, %c0_i32_0 : i32, i32
  }
  func.func @transform_3(%arg0: i32) -> (i32, i32) {
    %c0_i32 = arith.constant 0 : i32
    %c0_i32_0 = arith.constant 0 : i32
    %c0_i32_1 = arith.constant 0 : i32
    return %c0_i32, %c0_i32_0 : i32, i32
  }
  func.func @transform_4(%arg0: i32) -> (i32, i32) {
    %c0_i32 = arith.constant 0 : i32
    %c0_i32_0 = arith.constant 0 : i32
    %c0_i32_1 = arith.constant 0 : i32
    return %c0_i32, %c0_i32_0 : i32, i32
  }
  func.func @transform_5(%arg0: i32) -> (i32, i32) {
    %c0_i32 = arith.constant 0 : i32
    %c0_i32_0 = arith.constant 0 : i32
    %c0_i32_1 = arith.constant 0 : i32
    return %c0_i32, %c0_i32_0 : i32, i32
  }
  func.func @transform_6(%arg0: i32) -> (i32, i32) {
    %c0_i32 = arith.constant 0 : i32
    %c0_i32_0 = arith.constant 0 : i32
    %c0_i32_1 = arith.constant 0 : i32
    return %c0_i32, %c0_i32_0 : i32, i32
  }
  func.func @transform_7(%arg0: i32) -> (i32, i32) {
    %c0_i32 = arith.constant 0 : i32
    %c0_i32_0 = arith.constant 0 : i32
    return %arg0, %c0_i32 : i32, i32
  }
}

</mosaic_0001>

<bundles_post_ra>
// kernel: tpu_custom_call.1
= control target key start
LH: loop header
LB: loop body
LE: loop exit
PB: predicated region body
PF: predicated region fallthrough
CT: control target
= control target key end

     0   :  { %12 = vsyncpa [#allocation3], 0  ;;  %s805_s0 = inlined_call_operand.vmem [shape: f32[16,128], index: 0, kind: input, shape index: {}]   ;;  %s806_s1 = inlined_call_operand.vmem [shape: bf16[4,16,8], index: 1, kind: input, shape index: {}]   ;;  %s807_s2 = inlined_call_operand.hbm [shape: f32[64,192], index: 2, kind: input, shape index: {}]   ;;  %s808_s3 = inlined_call_operand.vmem [shape: f32[64,8], index: 3, kind: input, shape index: {}]   ;;  %s809_s4 = inlined_call_operand.vmem [shape: f32[8,64], index: 4, kind: input, shape index: {}]   ;;  %s810_s5 = inlined_call_operand.hbm [shape: f32[128,128], index: 5, kind: input, shape index: {}]   ;;  %s811_s6 = inlined_call_operand.vmem [shape: f32[1,128], index: 6, kind: input, shape index: {}]   ;;  %s812_s7 = inlined_call_operand.hbm [shape: f32[16,128], index: 7, kind: output, shape index: {}]  }
   0x1   :  { %13 = vsyncpa [#allocation6], 0 }
   0x2   :  { %14 = vsyncpa [#allocation4], 0  ;;  %s23_s26 = sshll.u32 %s807_s2, 4  ;;  %s660_s27 = smov [#allocation2]   ;;  %s24_s26 = int_to_ptr.hbm [resolvable:$true] %s23_s26 }
   0x3   :  { %s25_s28 = sshll.u32 %s660_s27, 4  ;;  %s40_s8 = sshll.u32 %s810_s5, 4  ;;  %s26_s28 = int_to_ptr.vmem [resolvable:$true] %s25_s28  ;;  %s41_s8 = int_to_ptr.hbm [resolvable:$true] %s40_s8 }
   0x4   :  { %s661_s9 = smov 256   ;;  %s662_s10 = smov 16  }
   0x5   :  { %31 = dma.hbm_to_vmem [thread:$0]  %s24_s26, 2048, %s26_s28, [#allocation3], %s661_s9, %s661_s9, %s662_s10  }
   0x6   :  { %s663_s11 = smov [#allocation5]   ;;  %s664_s13 = smov 128  }
   0x7   :  { %s42_s12 = sshll.u32 %s663_s11, 4  ;;  %s665_s14 = smov 8   ;;  %s43_s12 = int_to_ptr.vmem [resolvable:$true] %s42_s12 }
   0x8   :  { %48 = dma.hbm_to_vmem [thread:$0]  %s41_s8, 2048, %s43_s12, [#allocation6], %s664_s13, %s664_s13, %s665_s14  }
   0x9   :  { %654 = dma.done.wait [#allocation3], 2048  }
   0xa   :  { %655 = vsyncadd [#allocation3], 4294965248 }
   0xb   :  { %656 = dma.done.wait [#allocation6], 2048  }
   0xc   :  { %657 = vsyncadd [#allocation6], 4294965248  ;;  %v75_v0 = vld [vmem:[#allocation2 + $0x70] sm:$0xff]  ;;  %v59_v1 = vld [vmem:[%s805_s0] sm:$0xff]  ;;  %s666_s15 = smov 64   ;;  %vm77_vm0 = vcmask 523264  }
   0xd   :  { %v73_v2 = vld [vmem:[#allocation2 + $0x60] sm:$0xff]  ;;  %92 = vmatpush.msra.mxu0 %v75_v0  ;;  %130 = vrot.lane.b32.xlu0 %v59_v1, %s666_s15  ;;  %v71_v3 = vld [vmem:[#allocation2 + $0x50] sm:$0xff]  ;;  %v76_v4 = vld [vmem:[#allocation2 + $0x78] sm:$0xff]  ;;  %vm330_vm1 = vcmask 64512   ;;  %s667_s18 = smov [#allocation7]   ;;  %s496_s22 = sshll.u32 %s812_s7, 4  ;;  %s497_s22 = int_to_ptr.hbm [resolvable:$true] %s496_s22 }
   0xe   :  { %146 = vmatpush.msra.mxu2 %v75_v0  ;;  %v74_v5 = vld [vmem:[#allocation2 + $0x68] sm:$0xff]  ;;  %v69_v6 = vld [vmem:[#allocation2 + $0x40] sm:$0xff]  ;;  %115 = vmatpush.msra.mxu3 %v76_v4  ;;  %v72_v7 = vld [vmem:[#allocation2 + $0x58] sm:$0xff]  ;;  %s494_s19 = sshll.u32 %s667_s18, 4  ;;  %s495_s19 = int_to_ptr.vmem [resolvable:$true] %s494_s19 }
   0xf   :  { %93 = vmatpush.msra.mxu0 %v73_v2  ;;  %v67_v8 = vld [vmem:[#allocation2 + $0x30] sm:$0xff]  ;;  %v60_v9 = vld [vmem:[%s805_s0 + $0x8] sm:$0xff]  ;;  %v65_v11 = vld [vmem:[#allocation2 + $0x20] sm:$0xff] }
  0x10   :  { %147 = vmatpush.msra.mxu2 %v73_v2  ;;  %116 = vmatpush.msra.mxu3 %v74_v5  ;;  %v70_v10 = vld [vmem:[#allocation2 + $0x48] sm:$0xff]  ;;  %v68_v12 = vld [vmem:[#allocation2 + $0x38] sm:$0xff]  ;;  %v63_v13 = vld [vmem:[#allocation2 + $0x10] sm:$0xff] }
  0x11   :  { %94 = vmatpush.msra.mxu0 %v71_v3  ;;  %v66_v14 = vld [vmem:[#allocation2 + $0x28] sm:$0xff]  ;;  %v61_v15 = vld [vmem:[#allocation2] sm:$0xff]  ;;  %v64_v16 = vld [vmem:[#allocation2 + $0x18] sm:$0xff] }
  0x12   :  { %148 = vmatpush.msra.mxu2 %v71_v3  ;;  %117 = vmatpush.msra.mxu3 %v72_v7  ;;  %v62_v17 = vld [vmem:[#allocation2 + $0x8] sm:$0xff]  ;;  %v215_v20 = vld [vmem:[%s808_s3 + $0x38] sm:$0xff]  ;;  %v214_v21 = vld [vmem:[%s808_s3 + $0x30] sm:$0xff] }
  0x13   :  { %95 = vmatpush.msra.mxu0 %v69_v6  ;;  %v213_v24 = vld [vmem:[%s808_s3 + $0x28] sm:$0xff]  ;;  %v212_v25 = vld [vmem:[%s808_s3 + $0x20] sm:$0xff]  ;;  %v211_v26 = vld [vmem:[%s808_s3 + $0x18] sm:$0xff] }
  0x14   :  { %149 = vmatpush.msra.mxu2 %v69_v6  ;;  %118 = vmatpush.msra.mxu3 %v70_v10  ;;  %v210_v27 = vld [vmem:[%s808_s3 + $0x10] sm:$0xff]  ;;  %v209_v28 = vld [vmem:[%s808_s3 + $0x8] sm:$0xff]  ;;  %v208_v29 = vld [vmem:[%s808_s3] sm:$0xff] }
  0x15   :  { %96 = vmatpush.msra.mxu0 %v67_v8  ;;  %132 = vrot.lane.b32.xlu0 %v60_v9, %s666_s15  ;;  %v329_v45 = vld [vmem:[%s809_s4] sm:$0xff] }
  0x16   :  { %150 = vmatpush.msra.mxu2 %v67_v8  ;;  %119 = vmatpush.msra.mxu3 %v68_v12  ;;  %v539_v52 = vld [vmem:[%s806_s1] sm:$0xff]  }
  0x17   :  { %97 = vmatpush.msra.mxu0 %v65_v11  ;;  %370 = vmatpush.msra.mxu1 %v329_v45  ;;  %v540_v57 = vunpack.c.l.bf16 %v539_v52  ;;  %v541_v0 = vunpack.c.h.bf16 %v539_v52  ;;  %v421_v45 = vld [vmem:[#allocation5 + $0x68] sm:$0xff] }
  0x18   :  { %151 = vmatpush.msra.mxu2 %v65_v11  ;;  %120 = vmatpush.msra.mxu3 %v66_v14 }
  0x19   :  { %98 = vmatpush.msra.mxu0 %v63_v13 }
  0x1a   :  { %152 = vmatpush.msra.mxu2 %v63_v13  ;;  %121 = vmatpush.msra.mxu3 %v64_v16 }
  0x1b   :  { %99 = vmatpush.msra.mxu0 %v61_v15 }
  0x1c   :  { %510 = vmatmul.msk.f32.vlgmr.msra.gmra.mxu0 %vm77_vm0, %v59_v1  ;;  %153 = vmatpush.msra.mxu2 %v61_v15 }
  0x1d   :  { %122 = vmatpush.msra.mxu3 %v62_v17  ;;  %248 = vmatpush.msrb.mxu0 %v215_v20 }
  0x1e   :  { %512 = vmatmul.msk.f32.vlgmr.msra.gmra.mxu3 %vm77_vm0, %v59_v1  ;;  %557 = vmatpush.msrb.mxu2 %v215_v20 }
  0x1f   :  { %169 = vmatpush.msrb.mxu3 %v76_v4  ;;  %249 = vmatpush.msrb.mxu0 %v214_v21  ;;  %v554_v4 = vld [vmem:[%s806_s1 + $0x8] sm:$0xff]  }
  0x20   :  { %558 = vmatpush.msrb.mxu2 %v214_v21  ;;  %v544_v8 = vunpack.c.l.bf16 %v554_v4  ;;  %v545_v13 = vunpack.c.h.bf16 %v554_v4 }
  0x21   :  { %170 = vmatpush.msrb.mxu3 %v74_v5  ;;  %250 = vmatpush.msrb.mxu0 %v213_v24 }
  0x22   :  { %559 = vmatpush.msrb.mxu2 %v213_v24 }
  0x23   :  { %171 = vmatpush.msrb.mxu3 %v72_v7  ;;  %251 = vmatpush.msrb.mxu0 %v212_v25 }
  0x24   :  { %511 = vmatmul.msk.f32.gmra.mxu0 %vm77_vm0, %v60_v9  ;;  %560 = vmatpush.msrb.mxu2 %v212_v25 }
  0x25   :  { %172 = vmatpush.msrb.mxu3 %v70_v10  ;;  %252 = vmatpush.msrb.mxu0 %v211_v26 }
  0x26   :  { %513 = vmatmul.msk.f32.gmra.mxu3 %vm77_vm0, %v60_v9  ;;  %561 = vmatpush.msrb.mxu2 %v211_v26  ;;  %v556_v26 = vld [vmem:[%s806_s1 + $0x18] sm:$0xff]  }
  0x27   :  { %173 = vmatpush.msrb.mxu3 %v68_v12  ;;  %253 = vmatpush.msrb.mxu0 %v210_v27 }
  0x28   :  { %562 = vmatpush.msrb.mxu2 %v210_v27 }
  0x29   :  { %174 = vmatpush.msrb.mxu3 %v66_v14  ;;  %254 = vmatpush.msrb.mxu0 %v209_v28 }
  0x2a   :  { %563 = vmatpush.msrb.mxu2 %v209_v28  ;;  %v552_v28 = vunpack.c.l.bf16 %v556_v26 }
  0x2b   :  { %175 = vmatpush.msrb.mxu3 %v64_v16  ;;  %255 = vmatpush.msrb.mxu0 %v208_v29 }
  0x2c   :  { %564 = vmatpush.msrb.mxu2 %v208_v29 }
  0x2d   :  { %176 = vmatpush.msrb.mxu3 %v62_v17  ;;  %v555_v17 = vld [vmem:[%s806_s1 + $0x10] sm:$0xff]  }
  0x2e   :  { %v549_v24 = vunpack.c.h.bf16 %v555_v17 }
  0x7f   :  { %v131_v18 = vpop.permute.xlu0 %130 }
  0x80   :  { %514 = vmatmul.msk.f32.vlgmr.msra.gmra.mxu2 %vm77_vm0, %v131_v18  ;;  %516 = vmatmul.msk.f32.vlgmr.msrb.gmra.mxu3 %vm77_vm0, %v131_v18 }
  0x87   :  { %v133_v19 = vpop.permute.xlu0 %132 }
  0x88   :  { %515 = vmatmul.msk.f32.gmra.mxu2 %vm77_vm0, %v133_v19  ;;  %517 = vmatmul.msk.f32.gmra.mxu3 %vm77_vm0, %v133_v19  ;;  %v548_v19 = vunpack.c.l.bf16 %v555_v17 }
  0x99   :  { %v101_v22 = vpop.f32.mrf.mxu0 }
  0x9a   :  { %186 = vrot.lane.b32.xlu1 %v101_v22, %s666_s15 }
  0xa1   :  { %v104_v23 = vpop.f32.mrf.mxu0 }
  0xa2   :  { %188 = vrot.lane.b32.xlu1 %v104_v23, %s666_s15 }
 0x103   :  { %v155_v30 = vpop.f32.mrf.mxu2 }
 0x104   :  { %196 = vrot.lane.b32.xlu2 %v155_v30, %s666_s15 }
 0x10b   :  { %v158_v31 = vpop.f32.mrf.mxu2 }
 0x10c   :  { %198 = vrot.lane.b32.xlu2 %v158_v31, %s666_s15  ;;  %v187_v32 = vpop.permute.xlu1 %186 }
 0x10d   :  { %v192_v33 = vmul.f32 %v187_v32, %v101_v22  ;;  %v204_v43 = vmul.f32 %v187_v32, %v155_v30 }
 0x10f   :  { %518 = vmatmul.msk.f32.vlgmr.msrb.gmra.mxu0 %vm77_vm0, %v192_v33  ;;  %v415_v33 = vld [vmem:[#allocation5 + $0x38] sm:$0xff] }
 0x110   :  { %467 = vmatpush.msra.mxu3 %v415_v33 }
 0x114   :  { %v189_v34 = vpop.permute.xlu1 %188 }
 0x115   :  { %v193_v35 = vmul.f32 %v189_v34, %v104_v23  ;;  %v205_v36 = vmul.f32 %v189_v34, %v158_v31  ;;  %v414_v34 = vld [vmem:[#allocation5 + $0x30] sm:$0xff] }
 0x116   :  { %468 = vmatpush.msra.mxu3 %v414_v34 }
 0x117   :  { %519 = vmatmul.msk.f32.gmra.mxu0 %vm77_vm0, %v193_v35  ;;  %523 = vmatmul.msk.f32.vlgmr.msrb.gmra.mxu2 %vm77_vm0, %v205_v36  ;;  %v413_v35 = vld [vmem:[#allocation5 + $0x28] sm:$0xff]  ;;  %v412_v36 = vld [vmem:[#allocation5 + $0x20] sm:$0xff] }
 0x118   :  { %469 = vmatpush.msra.mxu3 %v413_v35 }
 0x11a   :  { %470 = vmatpush.msra.mxu3 %v412_v36 }
 0x15e   :  { %v197_v37 = vpop.permute.xlu2 %196 }
 0x15f   :  { %v202_v38 = vmul.f32 %v197_v37, %v101_v22  ;;  %v206_v39 = vmul.f32 %v197_v37, %v155_v30  ;;  %v411_v37 = vld [vmem:[#allocation5 + $0x18] sm:$0xff] }
 0x160   :  { %471 = vmatpush.msra.mxu3 %v411_v37 }
 0x161   :  { %520 = vmatmul.msk.f32.gmra.mxu0 %vm77_vm0, %v202_v38  ;;  %524 = vmatmul.msk.f32.gmra.mxu2 %vm77_vm0, %v206_v39  ;;  %v410_v38 = vld [vmem:[#allocation5 + $0x10] sm:$0xff]  ;;  %v409_v39 = vld [vmem:[#allocation5 + $0x8] sm:$0xff] }
 0x162   :  { %472 = vmatpush.msra.mxu3 %v410_v38 }
 0x164   :  { %473 = vmatpush.msra.mxu3 %v409_v39 }
 0x166   :  { %v199_v40 = vpop.permute.xlu2 %198 }
 0x167   :  { %v203_v41 = vmul.f32 %v199_v40, %v104_v23  ;;  %v207_v42 = vmul.f32 %v199_v40, %v158_v31  ;;  %v553_v31 = vunpack.c.h.bf16 %v556_v26  ;;  %v408_v40 = vld [vmem:[#allocation5] sm:$0xff] }
 0x168   :  { %474 = vmatpush.msra.mxu3 %v408_v40 }
 0x169   :  { %521 = vmatmul.msk.f32.gmra.mxu0 %vm77_vm0, %v203_v41  ;;  %525 = vmatmul.msk.f32.gmra.mxu2 %vm77_vm0, %v207_v42  ;;  %v124_v41 = vpop.f32.mrf.mxu3  ;;  %v423_v42 = vld [vmem:[#allocation5 + $0x78] sm:$0xff] }
 0x16a   :  { %438 = vmatpush.msra.mxu2 %v423_v42 }
 0x171   :  { %522 = vmatmul.msk.f32.gmra.mxu0 %vm77_vm0, %v204_v43 }
 0x18c   :  { %v257_v44 = vpop.f32.mrf.mxu0 }
 0x194   :  { %v260_v46 = vpop.f32.mrf.mxu0 }
 0x19a   :  { %v272_v53 = vpop.f32.mrf.mxu2 }
 0x1de   :  { %v263_v47 = vpop.f32.mrf.mxu0 }
 0x1df   :  { %v281_v48 = vsub.f32 %v257_v44, %v263_v47  ;;  %v422_v44 = vld [vmem:[#allocation5 + $0x70] sm:$0xff]  ;;  %v127_v47 = vpop.f32.mrf.mxu3 }
 0x1e0   :  { %439 = vmatpush.msra.mxu2 %v422_v44 }
 0x1e1   :  { %v283_v49 = vmul.f32 0.5, %v281_v48 }
 0x1e2   :  { %440 = vmatpush.msra.mxu2 %v421_v45 }
 0x1e3   :  { %574 = vtanh.f32 %v283_v49  ;;  %v419_v49 = vld [vmem:[#allocation5 + $0x58] sm:$0xff] }
 0x1e4   :  { %v275_v60 = vpop.f32.mrf.mxu2 }
 0x1e6   :  { %v266_v50 = vpop.f32.mrf.mxu0 }
 0x1e7   :  { %v282_v51 = vsub.f32 %v260_v46, %v266_v50  ;;  %v420_v46 = vld [vmem:[#allocation5 + $0x60] sm:$0xff]  ;;  %v418_v50 = vld [vmem:[#allocation5 + $0x50] sm:$0xff]  ;;  %v178_v52 = vpop.f32.mrf.mxu3 }
 0x1e8   :  { %441 = vmatpush.msra.mxu2 %v420_v46 }
 0x1e9   :  { %v575_v54 = vpop.eup %574  ;;  %v284_v55 = vmul.f32 0.5, %v282_v51  ;;  %v417_v51 = vld [vmem:[#allocation5 + $0x48] sm:$0xff] }
 0x1ea   :  { %v287_v56 = vadd.f32 1.0, %v575_v54  ;;  %442 = vmatpush.msra.mxu2 %v419_v49 }
 0x1eb   :  { %576 = vtanh.f32 %v284_v55 }
 0x1ec   :  { %v289_v58 = vmul.f32 0.5, %v287_v56  ;;  %v278_v7 = vpop.f32.mrf.mxu2  ;;  %443 = vmatpush.msra.mxu2 %v418_v50 }
 0x1ed   :  { %v294_v9 = vsub.f32 %v272_v53, %v278_v7 }
 0x1ee   :  { %v321_v59 = vmul.f32 %v540_v57, %v289_v58  ;;  %v269_v63 = vpop.f32.mrf.mxu0  ;;  %v291_v6 = vsub.f32 1.0, %v289_v58  ;;  %444 = vmatpush.msra.mxu2 %v417_v51  ;;  %v416_v57 = vld [vmem:[#allocation5 + $0x40] sm:$0xff] }
 0x1ef   :  { %v293_v2 = vsub.f32 %v269_v63, %v275_v60  ;;  %v296_v11 = vmul.f32 0.5, %v294_v9  ;;  %v181_v58 = vpop.f32.mrf.mxu3 }
 0x1f0   :  { %526 = vmatmul.msk.f32.vlgmr.msra.gmra.mxu1 %vm330_vm1, %v321_v59  ;;  %v323_v10 = vmul.f32 %v544_v8, %v291_v6  ;;  %445 = vmatpush.msra.mxu2 %v416_v57 }
 0x1f1   :  { %v577_v61 = vpop.eup %576  ;;  %v295_v5 = vmul.f32 0.5, %v293_v2 }
 0x1f2   :  { %v288_v62 = vadd.f32 1.0, %v577_v61 }
 0x1f3   :  { %578 = vtanh.f32 %v295_v5 }
 0x1f4   :  { %v290_v1 = vmul.f32 0.5, %v288_v62  ;;  %580 = vtanh.f32 %v296_v11 }
 0x1f6   :  { %v322_v3 = vmul.f32 %v541_v0, %v290_v1  ;;  %v292_v12 = vsub.f32 1.0, %v290_v1 }
 0x1f8   :  { %527 = vmatmul.msk.f32.gmra.mxu1 %vm330_vm1, %v322_v3  ;;  %v324_v16 = vmul.f32 %v545_v13, %v292_v12 }
 0x1f9   :  { %v579_v14 = vpop.eup %578 }
 0x1fa   :  { %v299_v15 = vadd.f32 1.0, %v579_v14  ;;  %v581_v20 = vpop.eup %580 }
 0x1fb   :  { %v300_v21 = vadd.f32 1.0, %v581_v20 }
 0x1fc   :  { %v301_v18 = vmul.f32 0.5, %v299_v15 }
 0x1fd   :  { %v302_v23 = vmul.f32 0.5, %v300_v21 }
 0x1fe   :  { %v325_v22 = vmul.f32 %v548_v19, %v301_v18  ;;  %v303_v27 = vsub.f32 1.0, %v301_v18 }
 0x1ff   :  { %v326_v25 = vmul.f32 %v549_v24, %v302_v23  ;;  %v304_v30 = vsub.f32 1.0, %v302_v23 }
 0x200   :  { %528 = vmatmul.msk.f32.gmra.mxu1 %vm330_vm1, %v323_v10  ;;  %v327_v29 = vmul.f32 %v552_v28, %v303_v27  ;;  %v573_v10 = vld [vmem:[%s811_s6] ss:$0 sm:$0xff] }
 0x201   :  { %v328_v32 = vmul.f32 %v553_v31, %v304_v30 }
 0x208   :  { %529 = vmatmul.msk.f32.gmra.mxu1 %vm330_vm1, %v324_v16 }
 0x210   :  { %530 = vmatmul.msk.f32.gmra.mxu1 %vm330_vm1, %v325_v22 }
 0x218   :  { %531 = vmatmul.msk.f32.gmra.mxu1 %vm330_vm1, %v326_v25 }
 0x220   :  { %532 = vmatmul.msk.f32.gmra.mxu1 %vm330_vm1, %v327_v29 }
 0x228   :  { %533 = vmatmul.msk.f32.gmra.mxu1 %vm330_vm1, %v328_v32 }
 0x26d   :  { %v372_v43 = vpop.f32.mrf.mxu1 }
 0x26e   :  { %v396_v54 = vmul.f32 %v372_v43, %v124_v41 }
 0x275   :  { %v375_v48 = vpop.f32.mrf.mxu1 }
 0x276   :  { %v397_v60 = vmul.f32 %v375_v48, %v127_v47 }
 0x27d   :  { %v378_v53 = vpop.f32.mrf.mxu1 }
 0x27e   :  { %v398_v55 = vmul.f32 %v378_v53, %v178_v52 }
 0x280   :  { %v400_v56 = vadd.f32 %v398_v55, %v396_v54 }
 0x282   :  { %536 = vmatmul.msk.f32.vlgmr.msra.gmra.mxu3 %vm77_vm0, %v400_v56 }
 0x285   :  { %v381_v59 = vpop.f32.mrf.mxu1 }
 0x286   :  { %v399_v61 = vmul.f32 %v381_v59, %v181_v58 }
 0x288   :  { %v401_v62 = vadd.f32 %v399_v61, %v397_v60 }
 0x28a   :  { %537 = vmatmul.msk.f32.gmra.mxu3 %vm77_vm0, %v401_v62 }
 0x28d   :  { %v384_v63 = vpop.f32.mrf.mxu1 }
 0x28e   :  { %v402_v2 = vmul.f32 %v384_v63, %v124_v41 }
 0x295   :  { %v387_v0 = vpop.f32.mrf.mxu1 }
 0x296   :  { %v403_v6 = vmul.f32 %v387_v0, %v127_v47 }
 0x29d   :  { %v390_v1 = vpop.f32.mrf.mxu1 }
 0x29e   :  { %v404_v3 = vmul.f32 %v390_v1, %v178_v52 }
 0x2a0   :  { %v406_v4 = vadd.f32 %v404_v3, %v402_v2 }
 0x2a2   :  { %534 = vmatmul.msk.f32.vlgmr.msra.gmra.mxu2 %vm77_vm0, %v406_v4 }
 0x2a5   :  { %v393_v5 = vpop.f32.mrf.mxu1 }
 0x2a6   :  { %v405_v7 = vmul.f32 %v393_v5, %v181_v58 }
 0x2a8   :  { %v407_v8 = vadd.f32 %v405_v7, %v403_v6 }
 0x2aa   :  { %535 = vmatmul.msk.f32.gmra.mxu2 %vm77_vm0, %v407_v8 }
 0x305   :  { %v476_v9 = vpop.f32.mrf.mxu3 }
 0x30d   :  { %v479_v14 = vpop.f32.mrf.mxu3 }
 0x325   :  { %v447_v11 = vpop.f32.mrf.mxu2 }
 0x326   :  { %v477_v12 = vadd.f32 %v476_v9, %v447_v11 }
 0x328   :  { %v486_v13 = vadd.f32 %v573_v10, %v477_v12 }
 0x32a   :  { %488 = vst [vmem:[#allocation7] sm:$0xff] %v486_v13 }
 0x32d   :  { %v450_v15 = vpop.f32.mrf.mxu2 }
 0x32e   :  { %v480_v16 = vadd.f32 %v479_v14, %v450_v15 }
 0x330   :  { %v487_v17 = vadd.f32 %v573_v10, %v480_v16 }
 0x332   :  { %489 = vst [vmem:[#allocation7 + $0x8] sm:$0xff] %v487_v17 }
 0x333   :  { %502 = dma.vmem_to_hbm [thread:$0]  %s495_s19, 256, %s497_s22, [#allocation4], %s664_s13, %s664_s13, %s665_s14  }
 0x334   :  { %658 = dma.done.wait [#allocation4], 256  }
 0x335   :  { %659 = vsyncadd [#allocation4], 4294967040 }
 0x336   :  { %507 = vsyncpa [#allocation3], 1 }
 0x337   :  { %508 = vsyncpa [#allocation6], 1 }
 0x338   :  { %509 = vsyncpa [#allocation4], 1 }

</bundles_post_ra>
